<compile_context>
chip_gen: v5e
topology: v5e:2x2
jax: 0.10.0
libtpu: 0.0.40
codegen_flags: <defaults>
</compile_context>

<pallas_src>
import functools

import jax
import jax.numpy as jnp
from jax.experimental import pallas as pl
from jax.experimental.pallas import tpu as pltpu


def _round_up(x, m):
    return ((x + m - 1) // m) * m


def _mlp_kernel(x_ref, w1_ref, b1_ref, w2_ref, b2_ref, w3_ref, b3_ref, o_ref):
    # All three matmuls + bias + ReLU fused; MXU accumulates in f32.
    h = jnp.dot(x_ref[...], w1_ref[...], preferred_element_type=jnp.float32)
    h = jnp.maximum(h + b1_ref[...], 0.0)
    h = jnp.dot(h.astype(w2_ref.dtype), w2_ref[...],
                preferred_element_type=jnp.float32)
    h = jnp.maximum(h + b2_ref[...], 0.0)
    o = jnp.dot(h.astype(w3_ref.dtype), w3_ref[...],
                preferred_element_type=jnp.float32)
    o = o + b3_ref[...]
    o_ref[...] = o.astype(o_ref.dtype)


@functools.partial(jax.jit, static_argnames=("row_tile", "use_bf16"))
def linear_ffnn_forward(x, w1, b1, w2, b2, w3, b3, *, row_tile=1024,
                        use_bf16=False):
    """x: [..., d_model] -> [..., output_length].

    Weights stored as (in_features, out_features) — i.e. transposed relative to
    PyTorch's nn.Linear.weight layout of (out, in) — so the kernel does x@W+b.
    """
    d_model = x.shape[-1]
    out_len = w3.shape[-1]
    lead = x.shape[:-1]
    out_dtype = x.dtype

    # MXU operand dtype (bf16 optional for v6e/v7x); accumulation stays f32.
    mxu_dtype = jnp.bfloat16 if use_bf16 else x.dtype
    sublane = 16 if mxu_dtype == jnp.bfloat16 else 8

    x2d = x.reshape(-1, d_model).astype(mxu_dtype)
    n_rows = x2d.shape[0]

    # ---- Row-tile sizing: big (up to row_tile), 128-friendly, sublane-safe ----
    aligned_rows = _round_up(n_rows, sublane)
    tm = min(_round_up(row_tile, 128), aligned_rows)
    tm = _round_up(tm, sublane)
    n_total = _round_up(n_rows, tm)
    if n_total != n_rows:
        x2d = jnp.pad(x2d, ((0, n_total - n_rows), (0, 0)))

    # ---- Lane-dense output: pad output columns up to a multiple of 128 ----
    out_pad = _round_up(out_len, 128)
    if out_pad != out_len:
        w3p = jnp.pad(w3, ((0, 0), (0, out_pad - out_len)))
        b3p = jnp.pad(b3, ((0, out_pad - out_len),))
    else:
        w3p, b3p = w3, b3

    w1c = w1.astype(mxu_dtype)
    w2c = w2.astype(mxu_dtype)
    w3c = w3p.astype(mxu_dtype)
    # Biases join the f32 accumulator path (v5e VPU has no bf16 anyway).
    b1_2d = b1.reshape(1, -1).astype(jnp.float32)
    b2_2d = b2.reshape(1, -1).astype(jnp.float32)
    b3_2d = b3p.reshape(1, -1).astype(jnp.float32)

    grid = (n_total // tm,)

    # ---- VMEM budget: tile footprint + resident weights, capped for v7x ----
    itm = jnp.dtype(mxu_dtype).itemsize
    ito = jnp.dtype(out_dtype).itemsize
    weight_bytes = ((d_model * 256 + 256 * 128 + 128 * out_pad) * itm
                    + (256 + 128 + out_pad) * 4)
    stream_bytes = tm * d_model * itm * 2 + tm * out_pad * ito * 2  # dbl-buffered
    interm_bytes = tm * (256 + 128 + out_pad) * 4                    # f32 live h1/h2/o
    need = 2 * weight_bytes + stream_bytes + interm_bytes
    vmem_limit = int(min(max(2 * need, 16 << 20), 64 << 20))

    out2d = pl.pallas_call(
        _mlp_kernel,
        out_shape=jax.ShapeDtypeStruct((n_total, out_pad), out_dtype),
        grid_spec=pltpu.PrefetchScalarGridSpec(
            num_scalar_prefetch=0,
            grid=grid,
            in_specs=[
                pl.BlockSpec((tm, d_model), lambda i: (i, 0)),     # x row tile
                pl.BlockSpec((d_model, 256), lambda i: (0, 0)),    # W1 (resident)
                pl.BlockSpec((1, 256), lambda i: (0, 0)),          # b1
                pl.BlockSpec((256, 128), lambda i: (0, 0)),        # W2 (resident)
                pl.BlockSpec((1, 128), lambda i: (0, 0)),          # b2
                pl.BlockSpec((128, out_pad), lambda i: (0, 0)),    # W3 (resident)
                pl.BlockSpec((1, out_pad), lambda i: (0, 0)),      # b3
            ],
            out_specs=pl.BlockSpec((tm, out_pad), lambda i: (i, 0)),
        ),
        compiler_params=pltpu.CompilerParams(
            dimension_semantics=("parallel",),
            vmem_limit_bytes=vmem_limit,
        ),
    )(x2d, w1c, b1_2d, w2c, b2_2d, w3c, b3_2d)

    out2d = out2d[:n_rows, :out_len]
    return out2d.reshape(*lead, out_len)


def init_params(key, d_model, output_length, dtype=jnp.float32):
    """Deterministic parameter init mirroring nn.Linear shapes.

    Stored as W: (in, out), b: (out,) so the kernel does x @ W + b.
    """
    ks = jax.random.split(key, 6)

    def lin(kw, kb, fan_in, fan_out):
        bound = 1.0 / jnp.sqrt(fan_in)
        w = jax.random.uniform(kw, (fan_in, fan_out), dtype, -bound, bound)
        b = jax.random.uniform(kb, (fan_out,), dtype, -bound, bound)
        return w, b

    w1, b1 = lin(ks[0], ks[1], d_model, 256)
    w2, b2 = lin(ks[2], ks[3], 256, 128)
    w3, b3 = lin(ks[4], ks[5], 128, output_length)
    return w1, b1, w2, b2, w3, b3


if __name__ == "__main__":
    d_model = 32
    output_length = 16
    batch, seq = 2, 8

    key = jax.random.PRNGKey(0)
    kx, kp = jax.random.split(key)

    x = jax.random.normal(kx, (batch, seq, d_model), jnp.float32)
    w1, b1, w2, b2, w3, b3 = init_params(kp, d_model, output_length)

    out = linear_ffnn_forward(x, w1, b1, w2, b2, w3, b3)
    out = jax.block_until_ready(out)

    # Pure-JAX reference check (f32 path).
    h = jnp.maximum(x @ w1 + b1, 0.0)
    h = jnp.maximum(h @ w2 + b2, 0.0)
    ref = h @ w3 + b3

    assert out.shape == (batch, seq, output_length), out.shape
    assert jnp.allclose(out, ref, atol=1e-5, rtol=1e-5), float(
        jnp.max(jnp.abs(out - ref))
    )

    # Exercise the large-tile path too (multiple row tiles, padded rows).
    xb = jax.random.normal(kx, (4, 600, d_model), jnp.float32)
    outb = jax.block_until_ready(
        linear_ffnn_forward(xb, w1, b1, w2, b2, w3, b3, row_tile=1024)
    )
    hb = jnp.maximum(xb @ w1 + b1, 0.0)
    hb = jnp.maximum(hb @ w2 + b2, 0.0)
    refb = hb @ w3 + b3
    assert outb.shape == (4, 600, output_length), outb.shape
    assert jnp.allclose(outb, refb, atol=1e-4, rtol=1e-4), float(
        jnp.max(jnp.abs(outb - refb))
    )

    print("KERNEL_OK")
</pallas_src>

<mosaic_0001>
module attributes {stable_mosaic.version = 11 : i64} {
  func.func @_mlp_kernel(%arg0: i32, %arg1: memref<16x32xf32, #tpu.memory_space<vmem>>, %arg2: memref<32x256xf32, #tpu.memory_space<vmem>>, %arg3: memref<1x256xf32, #tpu.memory_space<vmem>>, %arg4: memref<256x128xf32, #tpu.memory_space<vmem>>, %arg5: memref<1x128xf32, #tpu.memory_space<vmem>>, %arg6: memref<128x128xf32, #tpu.memory_space<vmem>>, %arg7: memref<1x128xf32, #tpu.memory_space<vmem>>, %arg8: memref<16x128xf32, #tpu.memory_space<vmem>>) attributes {dimension_semantics = [#tpu.dimension_semantics<parallel>], iteration_bounds = array<i64: 1>, scalar_prefetch = 0 : i64, scratch_operands = 0 : i64, tpu.core_type = #tpu.core_type<tc>, window_params = [{transform_indices = @transform_0, window_bounds = array<i64: 16, 32>}, {pipeline_mode = #tpu.pipeline_mode<synchronous>, transform_indices = @transform_1, window_bounds = array<i64: 32, 256>}, {pipeline_mode = #tpu.pipeline_mode<synchronous>, transform_indices = @transform_2, window_bounds = array<i64: 1, 256>}, {pipeline_mode = #tpu.pipeline_mode<synchronous>, transform_indices = @transform_3, window_bounds = array<i64: 256, 128>}, {pipeline_mode = #tpu.pipeline_mode<synchronous>, transform_indices = @transform_4, window_bounds = array<i64: 1, 128>}, {pipeline_mode = #tpu.pipeline_mode<synchronous>, transform_indices = @transform_5, window_bounds = array<i64: 128, 128>}, {pipeline_mode = #tpu.pipeline_mode<synchronous>, transform_indices = @transform_6, window_bounds = array<i64: 1, 128>}, {transform_indices = @transform_7, window_bounds = array<i64: 16, 128>}]} {
    %c0 = arith.constant 0 : index
    %c0_0 = arith.constant 0 : index
    %0 = vector.load %arg1[%c0, %c0_0] : memref<16x32xf32, #tpu.memory_space<vmem>>, vector<16x32xf32>
    %c0_1 = arith.constant 0 : index
    %c0_2 = arith.constant 0 : index
    %1 = vector.load %arg2[%c0_1, %c0_2] : memref<32x256xf32, #tpu.memory_space<vmem>>, vector<32x256xf32>
    %cst = arith.constant dense<0.000000e+00> : vector<16x256xf32>
    %2 = tpu.matmul %0, %1, %cst {dimension_numbers = #tpu.dot_dimension_numbers<[1], [0], [0], [1], [0, 0, 1, 1], [], []>} : vector<16x32xf32>, vector<32x256xf32>, vector<16x256xf32> -> vector<16x256xf32>
    %c0_3 = arith.constant 0 : index
    %c0_4 = arith.constant 0 : index
    %3 = vector.load %arg3[%c0_3, %c0_4] : memref<1x256xf32, #tpu.memory_space<vmem>>, vector<1x256xf32>
    %4 = vector.broadcast %3 : vector<1x256xf32> to vector<16x256xf32>
    %5 = arith.addf %2, %4 : vector<16x256xf32>
    %cst_5 = arith.constant 0.000000e+00 : f32
    %6 = vector.broadcast %cst_5 : f32 to vector<16x256xf32>
    %7 = arith.maximumf %5, %6 : vector<16x256xf32>
    %c0_6 = arith.constant 0 : index
    %c0_7 = arith.constant 0 : index
    %8 = vector.load %arg4[%c0_6, %c0_7] : memref<256x128xf32, #tpu.memory_space<vmem>>, vector<256x128xf32>
    %cst_8 = arith.constant dense<0.000000e+00> : vector<16x128xf32>
    %9 = tpu.matmul %7, %8, %cst_8 {dimension_numbers = #tpu.dot_dimension_numbers<[1], [0], [0], [1], [0, 0, 1, 1], [], []>} : vector<16x256xf32>, vector<256x128xf32>, vector<16x128xf32> -> vector<16x128xf32>
    %c0_9 = arith.constant 0 : index
    %c0_10 = arith.constant 0 : index
    %10 = vector.load %arg5[%c0_9, %c0_10] : memref<1x128xf32, #tpu.memory_space<vmem>>, vector<1x128xf32>
    %11 = vector.broadcast %10 : vector<1x128xf32> to vector<16x128xf32>
    %12 = arith.addf %9, %11 : vector<16x128xf32>
    %cst_11 = arith.constant 0.000000e+00 : f32
    %13 = vector.broadcast %cst_11 : f32 to vector<16x128xf32>
    %14 = arith.maximumf %12, %13 : vector<16x128xf32>
    %c0_12 = arith.constant 0 : index
    %c0_13 = arith.constant 0 : index
    %15 = vector.load %arg6[%c0_12, %c0_13] : memref<128x128xf32, #tpu.memory_space<vmem>>, vector<128x128xf32>
    %cst_14 = arith.constant dense<0.000000e+00> : vector<16x128xf32>
    %16 = tpu.matmul %14, %15, %cst_14 {dimension_numbers = #tpu.dot_dimension_numbers<[1], [0], [0], [1], [0, 0, 1, 1], [], []>} : vector<16x128xf32>, vector<128x128xf32>, vector<16x128xf32> -> vector<16x128xf32>
    %c0_15 = arith.constant 0 : index
    %c0_16 = arith.constant 0 : index
    %17 = vector.load %arg7[%c0_15, %c0_16] : memref<1x128xf32, #tpu.memory_space<vmem>>, vector<1x128xf32>
    %18 = vector.broadcast %17 : vector<1x128xf32> to vector<16x128xf32>
    %19 = arith.addf %16, %18 : vector<16x128xf32>
    %c0_17 = arith.constant 0 : index
    %c0_18 = arith.constant 0 : index
    %20 = vector.load %arg8[%c0_17, %c0_18] : memref<16x128xf32, #tpu.memory_space<vmem>>, vector<16x128xf32>
    tpu.vector_store %arg8[%c0_17, %c0_18], %19 {strides = array<i32>} : memref<16x128xf32, #tpu.memory_space<vmem>>, vector<16x128xf32>,
    return
  }
  func.func @transform_0(%arg0: i32) -> (i32, i32) {
    %c0_i32 = arith.constant 0 : i32
    %c0_i32_0 = arith.constant 0 : i32
    return %arg0, %c0_i32 : i32, i32
  }
  func.func @transform_1(%arg0: i32) -> (i32, i32) {
    %c0_i32 = arith.constant 0 : i32
    %c0_i32_0 = arith.constant 0 : i32
    %c0_i32_1 = arith.constant 0 : i32
    return %c0_i32, %c0_i32_0 : i32, i32
  }
  func.func @transform_2(%arg0: i32) -> (i32, i32) {
    %c0_i32 = arith.constant 0 : i32
    %c0_i32_0 = arith.constant 0 : i32
    %c0_i32_1 = arith.constant 0 : i32
    return %c0_i32, %c0_i32_0 : i32, i32
  }
  func.func @transform_3(%arg0: i32) -> (i32, i32) {
    %c0_i32 = arith.constant 0 : i32
    %c0_i32_0 = arith.constant 0 : i32
    %c0_i32_1 = arith.constant 0 : i32
    return %c0_i32, %c0_i32_0 : i32, i32
  }
  func.func @transform_4(%arg0: i32) -> (i32, i32) {
    %c0_i32 = arith.constant 0 : i32
    %c0_i32_0 = arith.constant 0 : i32
    %c0_i32_1 = arith.constant 0 : i32
    return %c0_i32, %c0_i32_0 : i32, i32
  }
  func.func @transform_5(%arg0: i32) -> (i32, i32) {
    %c0_i32 = arith.constant 0 : i32
    %c0_i32_0 = arith.constant 0 : i32
    %c0_i32_1 = arith.constant 0 : i32
    return %c0_i32, %c0_i32_0 : i32, i32
  }
  func.func @transform_6(%arg0: i32) -> (i32, i32) {
    %c0_i32 = arith.constant 0 : i32
    %c0_i32_0 = arith.constant 0 : i32
    %c0_i32_1 = arith.constant 0 : i32
    return %c0_i32, %c0_i32_0 : i32, i32
  }
  func.func @transform_7(%arg0: i32) -> (i32, i32) {
    %c0_i32 = arith.constant 0 : i32
    %c0_i32_0 = arith.constant 0 : i32
    return %arg0, %c0_i32 : i32, i32
  }
}

</mosaic_0001>

<bundles_post_ra>
// kernel: linear_ffnn_forward.1
= control target key start
LH: loop header
LB: loop body
LE: loop exit
PB: predicated region body
PF: predicated region fallthrough
CT: control target
= control target key end

     0   :  { %vm42_vm0 = vcmask 261120   ;;  %s471_s1 = inlined_call_operand.vmem [shape: f32[32,256], index: 1, kind: input, shape index: {}]   ;;  %s472_s3 = inlined_call_operand.vmem [shape: f32[256,128], index: 3, kind: input, shape index: {}]   ;;  %s473_s0 = inlined_call_operand.vmem [shape: f32[16,32], index: 0, kind: input, shape index: {}]   ;;  %s474_s4 = inlined_call_operand.vmem [shape: f32[1,128], index: 4, kind: input, shape index: {}]   ;;  %s475_s2 = inlined_call_operand.vmem [shape: f32[1,256], index: 2, kind: input, shape index: {}]   ;;  %s476_s5 = inlined_call_operand.vmem [shape: f32[128,128], index: 5, kind: input, shape index: {}]   ;;  %s477_s6 = inlined_call_operand.vmem [shape: f32[1,128], index: 6, kind: input, shape index: {}]   ;;  %s478_s7 = inlined_call_operand.vmem [shape: f32[16,128], index: 7, kind: output, shape index: {}]  }
   0x1   :  { %v34_v0 = vld [vmem:[%s471_s1 + $0x30] sm:$0xff]  ;;  %v32_v1 = vld [vmem:[%s471_s1 + $0x20] sm:$0xff]  ;;  %v114_v3 = vld [vmem:[%s472_s3 + $0x78] sm:$0xff] }
   0x2   :  { %61 = vmatpush.msra.mxu1 %v34_v0  ;;  %v30_v2 = vld [vmem:[%s471_s1 + $0x10] sm:$0xff]  ;;  %v28_v5 = vld [vmem:[%s471_s1] sm:$0xff]  ;;  %135 = vmatpush.msra.mxu2 %v114_v3  ;;  %v112_v7 = vld [vmem:[%s472_s3 + $0x68] sm:$0xff] }
   0x3   :  { %v113_v4 = vld [vmem:[%s472_s3 + $0x70] sm:$0xff]  ;;  %v26_v6 = vld [vmem:[%s473_s0] sm:$0xff]  ;;  %v35_v8 = vld [vmem:[%s471_s1 + $0x38] sm:$0xff] }
   0x4   :  { %62 = vmatpush.msra.mxu1 %v32_v1  ;;  %136 = vmatpush.msra.mxu2 %v113_v4  ;;  %v130_v9 = vld [vmem:[%s472_s3 + $0xf8] sm:$0xff]  ;;  %v111_v10 = vld [vmem:[%s472_s3 + $0x60] sm:$0xff]  ;;  %v129_v11 = vld [vmem:[%s472_s3 + $0xf0] sm:$0xff] }
   0x5   :  { %158 = vmatpush.msra.mxu3 %v130_v9  ;;  %v33_v12 = vld [vmem:[%s471_s1 + $0x28] sm:$0xff]  ;;  %v110_v14 = vld [vmem:[%s472_s3 + $0x58] sm:$0xff]  ;;  %v127_v16 = vld [vmem:[%s472_s3 + $0xe0] sm:$0xff] }
   0x6   :  { %63 = vmatpush.msra.mxu1 %v30_v2  ;;  %137 = vmatpush.msra.mxu2 %v112_v7  ;;  %v128_v13 = vld [vmem:[%s472_s3 + $0xe8] sm:$0xff]  ;;  %v31_v15 = vld [vmem:[%s471_s1 + $0x18] sm:$0xff]  ;;  %v109_v17 = vld [vmem:[%s472_s3 + $0x50] sm:$0xff] }
   0x7   :  { %159 = vmatpush.msra.mxu3 %v129_v11  ;;  %v29_v18 = vld [vmem:[%s471_s1 + $0x8] sm:$0xff]  ;;  %v126_v19 = vld [vmem:[%s472_s3 + $0xd8] sm:$0xff]  ;;  %v107_v22 = vld [vmem:[%s472_s3 + $0x40] sm:$0xff] }
   0x8   :  { %64 = vmatpush.msra.mxu1 %v28_v5  ;;  %138 = vmatpush.msra.mxu2 %v111_v10  ;;  %v27_v20 = vld [vmem:[%s473_s0 + $0x8] sm:$0xff]  ;;  %v106_v23 = vld [vmem:[%s472_s3 + $0x38] sm:$0xff]  ;;  %v105_v24 = vld [vmem:[%s472_s3 + $0x30] sm:$0xff] }
   0x9   :  { %232 = vmatmul.msk.f32.vlgmr.msra.gmra.mxu1 %vm42_vm0, %v26_v6  ;;  %160 = vmatpush.msra.mxu3 %v128_v13  ;;  %v108_v21 = vld [vmem:[%s472_s3 + $0x48] sm:$0xff]  ;;  %v103_v26 = vld [vmem:[%s472_s3 + $0x20] sm:$0xff]  ;;  %v102_v27 = vld [vmem:[%s472_s3 + $0x18] sm:$0xff] }
   0xa   :  { %84 = vmatpush.msrb.mxu1 %v35_v8  ;;  %139 = vmatpush.msra.mxu2 %v110_v14  ;;  %v104_v25 = vld [vmem:[%s472_s3 + $0x28] sm:$0xff]  ;;  %v101_v28 = vld [vmem:[%s472_s3 + $0x10] sm:$0xff]  ;;  %v99_v32 = vld [vmem:[%s472_s3] sm:$0xff] }
   0xb   :  { %161 = vmatpush.msra.mxu3 %v127_v16  ;;  %v125_v29 = vld [vmem:[%s472_s3 + $0xd0] sm:$0xff]  ;;  %v100_v30 = vld [vmem:[%s472_s3 + $0x8] sm:$0xff]  ;;  %v123_v33 = vld [vmem:[%s472_s3 + $0xc0] sm:$0xff] }
   0xc   :  { %85 = vmatpush.msrb.mxu1 %v33_v12  ;;  %140 = vmatpush.msra.mxu2 %v109_v17  ;;  %v124_v31 = vld [vmem:[%s472_s3 + $0xc8] sm:$0xff]  ;;  %v122_v34 = vld [vmem:[%s472_s3 + $0xb8] sm:$0xff]  ;;  %v121_v35 = vld [vmem:[%s472_s3 + $0xb0] sm:$0xff] }
   0xd   :  { %162 = vmatpush.msra.mxu3 %v126_v19  ;;  %v120_v36 = vld [vmem:[%s472_s3 + $0xa8] sm:$0xff]  ;;  %v119_v37 = vld [vmem:[%s472_s3 + $0xa0] sm:$0xff]  ;;  %v118_v38 = vld [vmem:[%s472_s3 + $0x98] sm:$0xff] }
   0xe   :  { %86 = vmatpush.msrb.mxu1 %v31_v15  ;;  %141 = vmatpush.msra.mxu2 %v108_v21  ;;  %v117_v39 = vld [vmem:[%s472_s3 + $0x90] sm:$0xff]  ;;  %v116_v40 = vld [vmem:[%s472_s3 + $0x88] sm:$0xff]  ;;  %v115_v41 = vld [vmem:[%s472_s3 + $0x80] sm:$0xff] }
   0xf   :  { %163 = vmatpush.msra.mxu3 %v125_v29  ;;  %v36_v42 = vld [vmem:[%s475_s2] sm:$0x3]  ;;  %v198_v44 = vld [vmem:[%s476_s5 + $0x78] sm:$0xff]  ;;  %v197_v45 = vld [vmem:[%s476_s5 + $0x70] sm:$0xff] }
  0x10   :  { %87 = vmatpush.msrb.mxu1 %v29_v18  ;;  %142 = vmatpush.msra.mxu2 %v107_v22  ;;  %v38_v43 = vperm.slane %v36_v42, 0  ;;  %v196_v46 = vld [vmem:[%s476_s5 + $0x68] sm:$0xff]  ;;  %v195_v49 = vld [vmem:[%s476_s5 + $0x60] sm:$0xff]  ;;  %v194_v51 = vld [vmem:[%s476_s5 + $0x58] sm:$0xff]  ;;  %v39_v55 = vperm.slane %v36_v42, 1 }
  0x11   :  { %233 = vmatmul.msk.f32.gmra.mxu1 %vm42_vm0, %v27_v20  ;;  %164 = vmatpush.msra.mxu3 %v124_v31  ;;  %v193_v62 = vld [vmem:[%s476_s5 + $0x50] sm:$0xff]  ;;  %v192_v63 = vld [vmem:[%s476_s5 + $0x48] sm:$0xff]  ;;  %v191_v0 = vld [vmem:[%s476_s5 + $0x40] sm:$0xff] }
  0x12   :  { %143 = vmatpush.msra.mxu2 %v106_v23  ;;  %203 = vmatpush.msra.mxu0 %v198_v44  ;;  %v190_v1 = vld [vmem:[%s476_s5 + $0x38] sm:$0xff]  ;;  %v189_v2 = vld [vmem:[%s476_s5 + $0x30] sm:$0xff]  ;;  %v188_v3 = vld [vmem:[%s476_s5 + $0x28] sm:$0xff] }
  0x13   :  { %165 = vmatpush.msra.mxu3 %v123_v33  ;;  %v187_v4 = vld [vmem:[%s476_s5 + $0x20] sm:$0xff]  ;;  %v186_v5 = vld [vmem:[%s476_s5 + $0x18] sm:$0xff]  ;;  %v184_v7 = vld [vmem:[%s476_s5 + $0x8] sm:$0xff] }
  0x14   :  { %144 = vmatpush.msra.mxu2 %v105_v24  ;;  %204 = vmatpush.msra.mxu0 %v197_v45  ;;  %v183_v8 = vld [vmem:[%s476_s5] sm:$0xff] }
  0x15   :  { %166 = vmatpush.msra.mxu3 %v122_v34  ;;  %v236_v10 = vld [vmem:[%s474_s4] ss:$0 sm:$0xff] }
  0x16   :  { %145 = vmatpush.msra.mxu2 %v104_v25  ;;  %205 = vmatpush.msra.mxu0 %v196_v46 }
  0x17   :  { %167 = vmatpush.msra.mxu3 %v121_v35 }
  0x18   :  { %146 = vmatpush.msra.mxu2 %v103_v26  ;;  %206 = vmatpush.msra.mxu0 %v195_v49 }
  0x19   :  { %234 = vmatmul.msk.f32.vlgmr.msrb.gmra.mxu1 %vm42_vm0, %v26_v6  ;;  %168 = vmatpush.msra.mxu3 %v120_v36  ;;  %v185_v6 = vld [vmem:[%s476_s5 + $0x10] sm:$0xff] }
  0x1a   :  { %147 = vmatpush.msra.mxu2 %v102_v27  ;;  %207 = vmatpush.msra.mxu0 %v194_v51 }
  0x1b   :  { %169 = vmatpush.msra.mxu3 %v119_v37 }
  0x1c   :  { %148 = vmatpush.msra.mxu2 %v101_v28  ;;  %208 = vmatpush.msra.mxu0 %v193_v62 }
  0x1d   :  { %170 = vmatpush.msra.mxu3 %v118_v38 }
  0x1e   :  { %149 = vmatpush.msra.mxu2 %v100_v30  ;;  %209 = vmatpush.msra.mxu0 %v192_v63 }
  0x1f   :  { %171 = vmatpush.msra.mxu3 %v117_v39 }
  0x20   :  { %150 = vmatpush.msra.mxu2 %v99_v32  ;;  %210 = vmatpush.msra.mxu0 %v191_v0 }
  0x21   :  { %235 = vmatmul.msk.f32.gmra.mxu1 %vm42_vm0, %v27_v20  ;;  %172 = vmatpush.msra.mxu3 %v116_v40  ;;  %v237_v20 = vld [vmem:[%s477_s6] ss:$0 sm:$0xff] }
  0x22   :  { %211 = vmatpush.msra.mxu0 %v190_v1 }
  0x23   :  { %173 = vmatpush.msra.mxu3 %v115_v41 }
  0x24   :  { %212 = vmatpush.msra.mxu0 %v189_v2 }
  0x26   :  { %213 = vmatpush.msra.mxu0 %v188_v3 }
  0x28   :  { %214 = vmatpush.msra.mxu0 %v187_v4 }
  0x2a   :  { %215 = vmatpush.msra.mxu0 %v186_v5 }
  0x2c   :  { %216 = vmatpush.msra.mxu0 %v185_v6 }
  0x2e   :  { %217 = vmatpush.msra.mxu0 %v184_v7 }
  0x30   :  { %218 = vmatpush.msra.mxu0 %v183_v8 }
  0x86   :  { %v66_v47 = vpop.f32.mrf.mxu1 }
  0x87   :  { %v67_v48 = vadd.f32 %v66_v47, %v38_v43 }
  0x89   :  { %v95_v50 = vmax.f32 %v67_v48, 0.0 }
  0x8b   :  { %151 = vmatmul.f32.vlgmr.msra.gmra.mxu2 %v95_v50 }
  0x8e   :  { %v69_v52 = vpop.f32.mrf.mxu1 }
  0x8f   :  { %v70_v53 = vadd.f32 %v69_v52, %v38_v43 }
  0x91   :  { %v97_v54 = vmax.f32 %v70_v53, 0.0 }
  0x93   :  { %154 = vmatmul.f32.gmra.mxu2 %v97_v54 }
  0x96   :  { %v89_v56 = vpop.f32.mrf.mxu1 }
  0x97   :  { %v90_v57 = vadd.f32 %v89_v56, %v39_v55 }
  0x99   :  { %v96_v58 = vmax.f32 %v90_v57, 0.0 }
  0x9b   :  { %174 = vmatmul.f32.vlgmr.msra.gmra.mxu3 %v96_v58 }
  0x9e   :  { %v92_v59 = vpop.f32.mrf.mxu1 }
  0x9f   :  { %v93_v60 = vadd.f32 %v92_v59, %v39_v55 }
  0xa1   :  { %v98_v61 = vmax.f32 %v93_v60, 0.0 }
  0xa3   :  { %177 = vmatmul.f32.gmra.mxu3 %v98_v61 }
 0x10e   :  { %v152_v9 = vpop.f32.mrf.mxu2 }
 0x10f   :  { %v153_v11 = vadd.f32 %v236_v10, %v152_v9 }
 0x116   :  { %v155_v15 = vpop.f32.mrf.mxu2 }
 0x117   :  { %v156_v16 = vadd.f32 %v236_v10, %v155_v15 }
 0x11e   :  { %v175_v12 = vpop.f32.mrf.mxu3 }
 0x11f   :  { %v176_v13 = vadd.f32 %v175_v12, %v153_v11 }
 0x121   :  { %v181_v14 = vmax.f32 %v176_v13, 0.0 }
 0x123   :  { %219 = vmatmul.f32.vlgmr.msra.gmra.mxu0 %v181_v14 }
 0x126   :  { %v178_v17 = vpop.f32.mrf.mxu3 }
 0x127   :  { %v179_v18 = vadd.f32 %v178_v17, %v156_v16 }
 0x129   :  { %v182_v19 = vmax.f32 %v179_v18, 0.0 }
 0x12b   :  { %222 = vmatmul.f32.gmra.mxu0 %v182_v19 }
 0x1a0   :  { %v220_v21 = vpop.f32.mrf.mxu0 }
 0x1a1   :  { %v221_v22 = vadd.f32 %v237_v20, %v220_v21 }
 0x1a3   :  { %226 = vst [vmem:[%s478_s7] sm:$0xff] %v221_v22 }
 0x1a8   :  { %v223_v23 = vpop.f32.mrf.mxu0 }
 0x1a9   :  { %v224_v24 = vadd.f32 %v237_v20, %v223_v23 }
 0x1ab   :  { %227 = vst [vmem:[%s478_s7 + $0x8] sm:$0xff] %v224_v24 }

</bundles_post_ra>
